<compile_context>
chip_gen: v7x
topology: tpu7x:2x2x1
jax: 0.10.0
libtpu: 0.0.40
codegen_flags: <defaults>
</compile_context>

<pallas_src>
import functools

import jax
import jax.numpy as jnp
from jax.experimental import pallas as pl
from jax.experimental.pallas import tpu as pltpu

LANE = 128
_MAX_STATIC_GROUPS = 16   # fully unroll the 128-lane group loop up to this
_MAX_GROWN_ROWS = 1024    # cap on t_bc when growing the batch-row tile


def _round_up(a: int, m: int) -> int:
    return ((a + m - 1) // m) * m


def _vmem_budget():
    """Per-generation scoped-VMEM limit and per-x-buffer budget."""
    cap = 0
    try:
        info = pltpu.get_tpu_info()
        cap = int(getattr(info, "vmem_capacity_bytes", 0) or 0)
    except Exception:
        cap = 0
    if cap <= 0:
        cap = 64 * 1024 * 1024                       # v7x physical; safe everywhere
    vmem_limit = min((cap * 3) // 4, 96 * 1024 * 1024)   # 48 MiB v7x, 96 MiB v5e/v6e
    per_buffer = vmem_limit // 4                          # x is double-buffered
    return int(vmem_limit), int(per_buffer)


def _choose_tiles(B, C, S_data, itemsize, O_pad, per_buffer):
    """Pick (tb, ts): longest contiguous spatial tile first, then grow rows."""
    sub_mult = 8 * max(1, 4 // itemsize)        # 8 (f32), 16 (bf16), 32 (int8)

    def feasible(d):
        if B % d:
            return False
        ok_out = (d % 8 == 0) or (d == B)               # output block rows
        ok_in = ((d * C) % sub_mult == 0) or (d == B)   # input block rows
        return ok_out and ok_in

    feas = [d for d in range(1, B + 1) if feasible(d)]  # d == B is always feasible
    if B >= 16:                                          # keep >= 2 batch steps (v7x)
        capped = [d for d in feas if d <= B // 2]
        if capped:
            feas = capped

    s_cap = max(LANE, (S_data // LANE) * LANE)

    tb = min(feas)                               # smallest rows -> longest ts
    ts = (per_buffer // (tb * C * itemsize)) // LANE * LANE
    ts = max(LANE, min(ts, s_cap))

    if ts >= s_cap:
        # One spatial tile covers everything: spend leftover budget on more
        # rows (fewer grid steps), keeping the finalize selection matmul tiny.
        ts = s_cap
        for d in sorted(feas):
            t_bc = d * C
            if t_bc > _MAX_GROWN_ROWS:
                continue
            x_bytes = t_bc * ts * itemsize
            aux_bytes = t_bc * LANE * 4 + d * t_bc * 4 + t_bc * O_pad * 4
            if x_bytes <= per_buffer and aux_bytes <= per_buffer:
                tb = d
    return tb, ts


def _encoder_flattener_kernel(x_ref, wtile_ref, msel_ref, b_ref, o_ref, acc_ref,
                              *, n_s, ts, rem_last, reg_carry):
    # x_ref:    [t_bc, ts]     streamed input tile (native dtype)
    # wtile_ref:[t_bc, O_pad]  f32, row r holds W[r % C, :] / S
    # msel_ref: [tb, t_bc]     f32 selection matrix (regroups rows -> batches)
    # b_ref:    [1, O_pad]     f32 bias
    # o_ref:    [tb, O_pad]    f32 output block
    # acc_ref:  [t_bc, LANE]   f32 accumulator scratch (persists across s-axis)
    s = pl.program_id(1)

    @pl.when(s == 0)
    def _init():
        acc_ref[...] = jnp.zeros_like(acc_ref)

    def accumulate(n_groups):
        # n_groups is a static Python int.
        if n_groups <= 0:
            return
        if reg_carry and n_groups <= _MAX_STATIC_GROUPS:
            # Short loop, small row tile: fully unrolled, register partial sum.
            part = x_ref[:, 0:LANE].astype(jnp.float32)
            for g in range(1, n_groups):
                part = part + x_ref[:, g * LANE:(g + 1) * LANE].astype(jnp.float32)
            acc_ref[...] += part
        elif reg_carry:
            # Long loop, small row tile: bounded unroll, register carry.
            def body(g, part):
                start = pl.multiple_of(g * LANE, LANE)
                return part + x_ref[:, pl.ds(start, LANE)].astype(jnp.float32)
            part = jax.lax.fori_loop(0, n_groups, body,
                                     jnp.zeros(acc_ref.shape, jnp.float32),
                                     unroll=8)
            acc_ref[...] += part
        else:
            # Large row tile: accumulate straight into VMEM scratch; the
            # per-group HBM time dominates, hiding the read-modify-write chain.
            def body(g, _):
                start = pl.multiple_of(g * LANE, LANE)
                acc_ref[...] += x_ref[:, pl.ds(start, LANE)].astype(jnp.float32)
                return 0
            jax.lax.fori_loop(0, n_groups, body, 0, unroll=8)

    n_groups_full = ts // LANE
    mask_needed = rem_last < ts          # static

    if not mask_needed:
        accumulate(n_groups_full)
    else:
        @pl.when(s < n_s - 1)
        def _interior():
            accumulate(n_groups_full)

        @pl.when(s == n_s - 1)
        def _boundary():
            full_g = rem_last // LANE
            partial = rem_last % LANE
            accumulate(full_g)           # valid full groups: no mask cost
            if partial:
                # Single partial 128-lane group: select-mask after load/cast
                # (boundary block bytes past the array edge are arbitrary).
                sl = x_ref[:, full_g * LANE:(full_g + 1) * LANE].astype(jnp.float32)
                lane = jax.lax.broadcasted_iota(jnp.int32, sl.shape, 1)
                acc_ref[...] += jnp.where(lane < partial, sl, 0.0)

    @pl.when(s == n_s - 1)
    def _finalize():
        row_sum = jnp.sum(acc_ref[...], axis=-1, keepdims=True)   # [t_bc, 1]
        scaled = row_sum * wtile_ref[...]                          # [t_bc, O_pad]
        y = jnp.dot(msel_ref[...], scaled,
                    preferred_element_type=jnp.float32)            # [tb, O_pad]
        o_ref[...] = (y + b_ref[...]).astype(o_ref.dtype)


def encoder_flattener(x, weight, bias, *, tb=None, ts=None):
    """x: [B, C, *spatial]; weight: [O, C] (PyTorch layout); bias: [O]."""
    B, C = int(x.shape[0]), int(x.shape[1])
    S = 1
    for d in x.shape[2:]:
        S *= int(d)
    O = int(weight.shape[0])
    assert int(weight.shape[1]) == C and int(bias.shape[0]) == O
    O_pad = _round_up(max(O, 1), LANE)
    itemsize = jnp.dtype(x.dtype).itemsize

    # [B, C, *spatial] -> [B*C, S]  (free for contiguous NCHW input).
    x_flat = x.reshape(B * C, S)
    S_data = S
    if S_data < LANE:                    # tiny spatial extent: pad to one lane group
        x_flat = jnp.pad(x_flat, ((0, 0), (0, LANE - S_data)))
        S_data = LANE

    vmem_limit, per_buffer = _vmem_budget()
    tb_auto, ts_auto = _choose_tiles(B, C, S_data, itemsize, O_pad, per_buffer)
    if tb is None:
        tb = tb_auto
    if ts is None:
        ts = ts_auto
    tb, ts = int(tb), int(ts)

    # Validate explicit tiles (no silent dropping of trailing batch rows).
    sub_mult = 8 * max(1, 4 // itemsize)
    t_bc = tb * C
    if (B % tb != 0 or not ((tb % 8 == 0) or (tb == B))
            or not ((t_bc % sub_mult == 0) or (tb == B))):
        raise ValueError(f"invalid batch tile tb={tb} for B={B}, C={C}, "
                         f"dtype={x.dtype}")
    if ts % LANE != 0 or ts > S_data:
        raise ValueError(f"invalid spatial tile ts={ts} for S={S_data}")

    n_b = B // tb
    n_s = int(pl.cdiv(S_data, ts))
    rem_last = S_data - (n_s - 1) * ts       # valid columns in the trailing tile
    reg_carry = t_bc <= 64                   # streaming partial fits in registers

    # Constant operands (built once per call; all f32, lane-dense):
    #   wtile : W^T / S, zero-padded to O_pad columns, tiled to t_bc rows.
    #   msel  : (tb, t_bc) selection matrix regrouping folded (b, c) rows -> b.
    inv_s = 1.0 / float(S)                   # divide by the TRUE spatial size
    w_pad = jnp.zeros((C, O_pad), jnp.float32).at[:, :O].set(
        weight.astype(jnp.float32).T * inv_s)
    wtile = jnp.tile(w_pad, (tb, 1))
    msel = (jnp.arange(t_bc, dtype=jnp.int32)[None, :] // C
            == jnp.arange(tb, dtype=jnp.int32)[:, None]).astype(jnp.float32)
    b_pad = jnp.zeros((1, O_pad), jnp.float32).at[:, :O].set(
        bias.astype(jnp.float32))

    kernel = functools.partial(_encoder_flattener_kernel,
                               n_s=n_s, ts=ts, rem_last=int(rem_last),
                               reg_carry=reg_carry)

    out = pl.pallas_call(
        kernel,
        out_shape=jax.ShapeDtypeStruct((B, O_pad), jnp.float32),
        grid_spec=pltpu.PrefetchScalarGridSpec(
            num_scalar_prefetch=0,
            grid=(n_b, n_s),                          # reduction (spatial) axis last
            in_specs=[
                pl.BlockSpec((t_bc, ts), lambda i, s: (i, s)),
                pl.BlockSpec((t_bc, O_pad), lambda i, s: (0, 0)),
                pl.BlockSpec((tb, t_bc), lambda i, s: (0, 0)),
                pl.BlockSpec((1, O_pad), lambda i, s: (0, 0)),
            ],
            out_specs=pl.BlockSpec((tb, O_pad), lambda i, s: (i, 0)),
            scratch_shapes=[pltpu.VMEM((t_bc, LANE), jnp.float32)],
        ),
        compiler_params=pltpu.CompilerParams(
            dimension_semantics=("parallel", "arbitrary"),
            vmem_limit_bytes=vmem_limit,
        ),
    )(x_flat, wtile, msel, b_pad)

    return out[:, :O].astype(x.dtype)


if __name__ == "__main__":
    key = jax.random.PRNGKey(0)
    kx, kw, kb, kx2, kx3 = jax.random.split(key, 5)

    B, C, H, W = 2, 4, 16, 16
    O = 8  # output_channels

    x = jax.random.normal(kx, (B, C, H, W), dtype=jnp.float32)

    # Deterministic Linear params (PyTorch-style uniform(-1/sqrt(C), 1/sqrt(C))).
    bound = 1.0 / float(C) ** 0.5
    weight = jax.random.uniform(kw, (O, C), minval=-bound, maxval=bound,
                                dtype=jnp.float32)
    bias = jax.random.uniform(kb, (O,), minval=-bound, maxval=bound,
                              dtype=jnp.float32)

    def ref_fn(xx):
        return jnp.mean(xx.reshape(xx.shape[0], xx.shape[1], -1), axis=-1) \
            @ weight.T + bias

    # 1) Spatial size multiple of 128: single-tile, fully unrolled path.
    out = jax.block_until_ready(encoder_flattener(x, weight, bias))
    assert out.shape == (B, O)
    assert jnp.allclose(out, ref_fn(x), atol=1e-5, rtol=1e-5)

    # 2) Spatial size not a multiple of 128: masked trailing-tile path.
    x2 = jax.random.normal(kx2, (B, C, 10, 13), dtype=jnp.float32)
    out2 = jax.block_until_ready(encoder_flattener(x2, weight, bias))
    assert jnp.allclose(out2, ref_fn(x2), atol=1e-5, rtol=1e-5)

    # 3) Larger spatial extent: exercises the fori_loop group-accumulate path.
    x3 = jax.random.normal(kx3, (B, C, 64, 64), dtype=jnp.float32)
    out3 = jax.block_until_ready(encoder_flattener(x3, weight, bias))
    assert jnp.allclose(out3, ref_fn(x3), atol=1e-5, rtol=1e-5)

    print("KERNEL_OK")
</pallas_src>

<mosaic_0001>
module attributes {stable_mosaic.version = 11 : i64} {
  func.func @_encoder_flattener_kernel(%arg0: i32, %arg1: i32, %arg2: memref<8x256xf32, #tpu.memory_space<vmem>>, %arg3: memref<8x128xf32, #tpu.memory_space<vmem>>, %arg4: memref<2x8xf32, #tpu.memory_space<vmem>>, %arg5: memref<1x128xf32, #tpu.memory_space<vmem>>, %arg6: memref<2x128xf32, #tpu.memory_space<vmem>>, %arg7: memref<8x128xf32, #tpu.memory_space<vmem>>) attributes {dimension_semantics = [#tpu.dimension_semantics<parallel>, #tpu.dimension_semantics<arbitrary>], iteration_bounds = array<i64: 1, 1>, scalar_prefetch = 0 : i64, scratch_operands = 1 : i64, tpu.core_type = #tpu.core_type<tc>, window_params = [{transform_indices = @transform_0, window_bounds = array<i64: 8, 256>}, {pipeline_mode = #tpu.pipeline_mode<synchronous>, transform_indices = @transform_1, window_bounds = array<i64: 8, 128>}, {pipeline_mode = #tpu.pipeline_mode<synchronous>, transform_indices = @transform_2, window_bounds = array<i64: 2, 8>}, {pipeline_mode = #tpu.pipeline_mode<synchronous>, transform_indices = @transform_3, window_bounds = array<i64: 1, 128>}, {transform_indices = @transform_4, window_bounds = array<i64: 2, 128>}]} {
    %c0_i32 = arith.constant 0 : i32
    %0 = arith.cmpi eq, %arg1, %c0_i32 : i32
    %1 = arith.extui %0 : i1 to i32
    %c0_i32_0 = arith.constant 0 : i32
    %2 = arith.cmpi ne, %1, %c0_i32_0 : i32
    scf.if %2 {
      %cst = arith.constant 0.000000e+00 : f32
      %12 = vector.broadcast %cst : f32 to vector<8x128xf32>
      %c0_9 = arith.constant 0 : index
      %c0_10 = arith.constant 0 : index
      %13 = vector.load %arg7[%c0_9, %c0_10] : memref<8x128xf32, #tpu.memory_space<vmem>>, vector<8x128xf32>
      tpu.vector_store %arg7[%c0_9, %c0_10], %12 {strides = array<i32>} : memref<8x128xf32, #tpu.memory_space<vmem>>, vector<8x128xf32>,
    } else {
    }
    %c0 = arith.constant 0 : index
    %c0_1 = arith.constant 0 : index
    %3 = vector.load %arg2[%c0, %c0_1] : memref<8x256xf32, #tpu.memory_space<vmem>>, vector<8x128xf32>
    %c0_2 = arith.constant 0 : index
    %c128 = arith.constant 128 : index
    %4 = vector.load %arg2[%c0_2, %c128] : memref<8x256xf32, #tpu.memory_space<vmem>>, vector<8x128xf32>
    %5 = arith.addf %3, %4 : vector<8x128xf32>
    %c0_3 = arith.constant 0 : index
    %c0_4 = arith.constant 0 : index
    %6 = vector.load %arg7[%c0_3, %c0_4] : memref<8x128xf32, #tpu.memory_space<vmem>>, vector<8x128xf32>
    %7 = arith.addf %6, %5 : vector<8x128xf32>
    %c0_5 = arith.constant 0 : index
    %c0_6 = arith.constant 0 : index
    %8 = vector.load %arg7[%c0_5, %c0_6] : memref<8x128xf32, #tpu.memory_space<vmem>>, vector<8x128xf32>
    tpu.vector_store %arg7[%c0_5, %c0_6], %7 {strides = array<i32>} : memref<8x128xf32, #tpu.memory_space<vmem>>, vector<8x128xf32>,
    %c0_i32_7 = arith.constant 0 : i32
    %9 = arith.cmpi eq, %arg1, %c0_i32_7 : i32
    %10 = arith.extui %9 : i1 to i32
    %c0_i32_8 = arith.constant 0 : i32
    %11 = arith.cmpi ne, %10, %c0_i32_8 : i32
    scf.if %11 {
      %c0_9 = arith.constant 0 : index
      %c0_10 = arith.constant 0 : index
      %12 = vector.load %arg7[%c0_9, %c0_10] : memref<8x128xf32, #tpu.memory_space<vmem>>, vector<8x128xf32>
      %cst = arith.constant dense<0.000000e+00> : vector<8xf32>
      %13 = vector.multi_reduction <add>, %12, %cst [1] : vector<8x128xf32> to vector<8xf32>
      %14 = vector.shape_cast %13 : vector<8xf32> to vector<8x1xf32>
      %c0_11 = arith.constant 0 : index
      %c0_12 = arith.constant 0 : index
      %15 = vector.load %arg3[%c0_11, %c0_12] : memref<8x128xf32, #tpu.memory_space<vmem>>, vector<8x128xf32>
      %16 = vector.broadcast %14 : vector<8x1xf32> to vector<8x128xf32>
      %17 = arith.mulf %16, %15 : vector<8x128xf32>
      %c0_13 = arith.constant 0 : index
      %c0_14 = arith.constant 0 : index
      %18 = vector.load %arg4[%c0_13, %c0_14] : memref<2x8xf32, #tpu.memory_space<vmem>>, vector<2x8xf32>
      %cst_15 = arith.constant dense<0.000000e+00> : vector<2x128xf32>
      %19 = tpu.matmul %18, %17, %cst_15 {dimension_numbers = #tpu.dot_dimension_numbers<[1], [0], [0], [1], [0, 0, 1, 1], [], []>} : vector<2x8xf32>, vector<8x128xf32>, vector<2x128xf32> -> vector<2x128xf32>
      %c0_16 = arith.constant 0 : index
      %c0_17 = arith.constant 0 : index
      %20 = vector.load %arg5[%c0_16, %c0_17] : memref<1x128xf32, #tpu.memory_space<vmem>>, vector<1x128xf32>
      %21 = vector.broadcast %20 : vector<1x128xf32> to vector<2x128xf32>
      %22 = arith.addf %19, %21 : vector<2x128xf32>
      %c0_18 = arith.constant 0 : index
      %c0_19 = arith.constant 0 : index
      %23 = vector.load %arg6[%c0_18, %c0_19] : memref<2x128xf32, #tpu.memory_space<vmem>>, vector<2x128xf32>
      tpu.vector_store %arg6[%c0_18, %c0_19], %22 {strides = array<i32>} : memref<2x128xf32, #tpu.memory_space<vmem>>, vector<2x128xf32>,
    } else {
    }
    return
  }
  func.func @transform_0(%arg0: i32, %arg1: i32) -> (i32, i32) {
    %c0_i32 = arith.constant 0 : i32
    return %arg0, %arg1 : i32, i32
  }
  func.func @transform_1(%arg0: i32, %arg1: i32) -> (i32, i32) {
    %c0_i32 = arith.constant 0 : i32
    %c0_i32_0 = arith.constant 0 : i32
    %c0_i32_1 = arith.constant 0 : i32
    return %c0_i32, %c0_i32_0 : i32, i32
  }
  func.func @transform_2(%arg0: i32, %arg1: i32) -> (i32, i32) {
    %c0_i32 = arith.constant 0 : i32
    %c0_i32_0 = arith.constant 0 : i32
    %c0_i32_1 = arith.constant 0 : i32
    return %c0_i32, %c0_i32_0 : i32, i32
  }
  func.func @transform_3(%arg0: i32, %arg1: i32) -> (i32, i32) {
    %c0_i32 = arith.constant 0 : i32
    %c0_i32_0 = arith.constant 0 : i32
    %c0_i32_1 = arith.constant 0 : i32
    return %c0_i32, %c0_i32_0 : i32, i32
  }
  func.func @transform_4(%arg0: i32, %arg1: i32) -> (i32, i32) {
    %c0_i32 = arith.constant 0 : i32
    %c0_i32_0 = arith.constant 0 : i32
    return %arg0, %c0_i32 : i32, i32
  }
}

</mosaic_0001>

<bundles_post_ra>
// kernel: tpu_custom_call.1
= control target key start
LH: loop header
LB: loop body
LE: loop exit
PB: predicated region body
PF: predicated region fallthrough
CT: control target
= control target key end

     0   :  { %9 = vsyncpa [#allocation4], 0  ;;  %s318_s0 = inlined_call_operand.hbm [shape: f32[8,256], index: 0, kind: input, shape index: {}]   ;;  %s319_s1 = inlined_call_operand.hbm [shape: f32[8,128], index: 1, kind: input, shape index: {}]   ;;  %s320_s2 = inlined_call_operand.vmem [shape: f32[2,8], index: 2, kind: input, shape index: {}]   ;;  %s321_s3 = inlined_call_operand.vmem [shape: f32[1,128], index: 3, kind: input, shape index: {}]   ;;  %s322_s4 = inlined_call_operand.hbm [shape: f32[2,128], index: 4, kind: output, shape index: {}]  }
   0x1   :  { %10 = vsyncpa [#allocation7], 0 }
   0x2   :  { %11 = vsyncpa [#allocation5], 0  ;;  %s246_s15 = smov [#allocation3]   ;;  %s247_s17 = smov [#allocation6]  }
   0x3   :  { %s18_s16 = sshll.u32 %s246_s15, 4  ;;  %s28_s18 = sshll.u32 %s247_s17, 4  ;;  %s19_s16 = int_to_ptr.vmem [resolvable:$true] %s18_s16  ;;  %s29_s18 = int_to_ptr.vmem [resolvable:$true] %s28_s18 }
   0x4   :  { %s174_s21 = scalar_lea.hbm %s318_s0, 256 }
   0x5   :  { %p175_p0 = scmp.ne.s32.totalorder %s318_s0, %s174_s21  ;;  %p178_p1 = scmp.lt.u32.totalorder %s174_s21, %s318_s0 }
   0x7   :  { %p180_p2 = pnand %p178_p1, %p175_p0 }
   0x9   :  { %183 = shalt.err (!%p180_p2)
}
   0xa   :  { %s184_s26 = scalar_lea.vmem %s19_s16, 256  ;;  %p189_p4 = scmp.lt.s32.totalorder %s19_s16, %s19_s16 }
   0xb   :  { %p185_p3 = scmp.ne.s32.totalorder %s19_s16, %s184_s26  ;;  %p190_p5 = scmp.lt.s32.totalorder %s184_s26, %s184_s26 }
   0xd   :  { %p191_p6 = por %p190_p5, %p189_p4 }
   0xf   :  { %p192_p7 = pnand %p191_p6, %p185_p3 }
  0x11   :  { %195 = shalt.err (!%p192_p7)
}
  0x12   :  { %21 = dma.hbm_to_vmem [thread:$0]  %s318_s0, 256, %s19_s16, [#allocation4]  }
  0x13   :  { %s196_s5 = scalar_lea.hbm %s319_s1, 128 }
  0x14   :  { %p197_p8 = scmp.ne.s32.totalorder %s319_s1, %s196_s5  ;;  %p200_p9 = scmp.lt.u32.totalorder %s196_s5, %s319_s1 }
  0x16   :  { %p202_p10 = pnand %p200_p9, %p197_p8 }
  0x18   :  { %205 = shalt.err (!%p202_p10)
}
  0x19   :  { %s206_s10 = scalar_lea.vmem %s29_s18, 128  ;;  %p211_p12 = scmp.lt.s32.totalorder %s29_s18, %s29_s18 }
  0x1a   :  { %p207_p11 = scmp.ne.s32.totalorder %s29_s18, %s206_s10  ;;  %p212_p13 = scmp.lt.s32.totalorder %s206_s10, %s206_s10 }
  0x1c   :  { %p213_p0 = por %p212_p13, %p211_p12 }
  0x1e   :  { %p214_p1 = pnand %p213_p0, %p207_p11 }
  0x20   :  { %217 = shalt.err (!%p214_p1)
}
  0x21   :  { %31 = dma.hbm_to_vmem [thread:$0]  %s319_s1, 128, %s29_s18, [#allocation7]  }
  0x22   :  { %240 = dma.done.wait [#allocation4], 256  }
  0x23   :  { %241 = vsyncadd [#allocation4], 4294967040 }
  0x24   :  { %242 = dma.done.wait [#allocation7], 128  }
  0x25   :  { %243 = vsyncadd [#allocation7], 4294967168  ;;  %v47_v0 = vld [vmem:[#allocation3] sm:$0xff]  ;;  %v48_v1 = vld [vmem:[#allocation3 + $0x8] sm:$0xff]  ;;  %v248_v3 = vmov 0.0   ;;  %vm249_vm0 = vmmov 0  }
  0x26   :  { %v49_v2 = vadd.f32 %v48_v1, %v47_v0  ;;  %164 = vmatprep.subr.mxu0 %v248_v3  ;;  %166 = vmatprep.mubr.msk.f32.mxu0 %vm249_vm0, %v248_v3  ;;  %v59_v4 = vld [vmem:[#allocation6] sm:$0xff]  ;;  %v61_v7 = vld [vmem:[%s320_s2] sm:$0x3]  ;;  %vm69_vm1 = vcmask 64512   ;;  %s250_s15 = smov [#allocation8]  }
  0x27   :  { %v160_v8 = vld [vmem:[%s321_s3] ss:$0 sm:$0xff]  ;;  %s150_s16 = sshll.u32 %s250_s15, 4  ;;  %s151_s16 = int_to_ptr.vmem [resolvable:$true] %s150_s16 }
  0x28   :  { %57 = vadd.xlane.f32.xlu0 %v49_v2  ;;  %s218_s17 = scalar_lea.vmem %s151_s16, 32  ;;  %p223_p3 = scmp.lt.s32.totalorder %s151_s16, %s151_s16 }
  0x29   :  { %p219_p2 = scmp.ne.s32.totalorder %s151_s16, %s218_s17  ;;  %p224_p4 = scmp.lt.s32.totalorder %s218_s17, %s218_s17 }
  0x2b   :  { %p225_p5 = por %p224_p4, %p223_p3 }
  0x2d   :  { %p226_p6 = pnand %p225_p5, %p219_p2 }
  0xb5   :  { %v58_v5 = vpop.xlane.xlu0 %57 }
  0xb6   :  { %v60_v6 = vmul.f32 %v59_v4, %v58_v5 }
  0xb8   :  { %165 = vmatpush3.msra.mxu0 %v60_v6 }
  0xb9   :  { %167 = vmatmul.mubr.msk.f32.vlgmr.msra.gmra.mrb[0].mxu0 %vm69_vm1, %v61_v7 }
 0x18c   :  { %v139_v9 = vpop.f32.mrb[0].mxu0 }
 0x18d   :  { %v140_v10 = vadd.f32 %v160_v8, %v139_v9  ;;  %v168_v11 = vpop.f32.mrb[1].mxu0 }
 0x18f   :  { %143 = vst [vmem:[#allocation8] sm:$0x3] %v140_v10 }
 0x190   :  { %229 = shalt.err (!%p226_p6)
}
 0x191   :  { %s230_s19 = scalar_lea.hbm %s322_s4, 32 }
 0x192   :  { %p231_p7 = scmp.ne.s32.totalorder %s322_s4, %s230_s19  ;;  %p234_p8 = scmp.lt.u32.totalorder %s230_s19, %s322_s4 }
 0x194   :  { %p236_p9 = pnand %p234_p8, %p231_p7 }
 0x196   :  { %239 = shalt.err (!%p236_p9)
}
 0x197   :  { %153 = dma.vmem_to_hbm [thread:$0]  %s151_s16, 32, %s322_s4, [#allocation5]  }
 0x198   :  { %244 = dma.done.wait [#allocation5], 32  }
 0x199   :  { %245 = vsyncadd [#allocation5], 4294967264 }
 0x19a   :  { %157 = vsyncpa [#allocation4], 1 }
 0x19b   :  { %158 = vsyncpa [#allocation7], 1 }
 0x19c   :  { %159 = vsyncpa [#allocation5], 1 }

</bundles_post_ra>
